<compile_context>
chip_gen: v7x
topology: tpu7x:2x2x1
jax: 0.10.0
libtpu: 0.0.40
codegen_flags: <defaults>
</compile_context>

<pallas_src>
import jax
import jax.numpy as jnp
from jax.experimental import pallas as pl
from jax.experimental.pallas import tpu as pltpu  # noqa: F401  (TPU backend)

GN_GROUPS = 32
GN_EPS = 1e-5
INV_SIG_EPS = 1e-5


# ----------------------------------------------------------------------------
# Kernel 1: 1x1 Conv (as one big matmul) + GroupNorm(32, hidden), batch folded
# ----------------------------------------------------------------------------
def _bottleneck_kernel(x_ref, w_ref, b_ref, gamma_ref, beta_ref,
                       sel_ref, sel_t_ref, agg_ref, agg_t_ref, o_ref):
    # x_ref:     (HW*B, Cin)   rows ordered (hw, b)   [f32 or bf16]
    # w_ref:     (Cin, Cout)                           [f32 or bf16]
    # b/gamma/beta: (1, Cout)   f32
    # sel_ref:   (HW*B, B)     one-hot row->sample     f32
    # sel_t_ref: (B, HW*B)     its transpose           f32
    # agg_ref:   (Cout, G)     one-hot channel->group  f32
    # agg_t_ref: (G, Cout)     its transpose           f32
    # o_ref:     (HW*B, Cout)
    y = jnp.dot(x_ref[...], w_ref[...],
                preferred_element_type=jnp.float32) + b_ref[...]        # (HW*B, C)

    rows, c = y.shape
    n_samples = sel_ref.shape[1]
    hw = rows // n_samples
    cg = c // GN_GROUPS
    n = jnp.float32(hw * cg)

    # Per-sample sums of y and y^2 in one matmul: (B, HW*B) @ (HW*B, 2C).
    yy = jnp.concatenate([y, y * y], axis=1)                            # (HW*B, 2C)
    ssum = jnp.dot(sel_t_ref[...], yy, preferred_element_type=jnp.float32)  # (B, 2C)
    s_c = ssum[:, :c]                                                   # (B, C)
    ss_c = ssum[:, c:]                                                  # (B, C)

    # Group aggregation + broadcast-back, fused to two matmuls.
    stat = jnp.concatenate([s_c, ss_c], axis=0)                         # (2B, C)
    gstat = jnp.dot(stat, agg_ref[...], preferred_element_type=jnp.float32)    # (2B, G)
    cstat = jnp.dot(gstat, agg_t_ref[...], preferred_element_type=jnp.float32)  # (2B, C)
    mean_c = cstat[:n_samples] / n                                      # (B, C)
    ex2_c = cstat[n_samples:] / n                                       # (B, C)
    var_c = jnp.maximum(ex2_c - mean_c * mean_c, 0.0)                   # clamp >= 0
    inv_c = jax.lax.rsqrt(var_c + GN_EPS)

    # Fold GroupNorm into per-(sample, channel) scale/shift and broadcast back
    # to rows with one selector matmul.
    scale_b = inv_c * gamma_ref[...]                                    # (B, C)
    shift_b = beta_ref[...] - mean_c * scale_b                          # (B, C)
    sb = jnp.concatenate([scale_b, shift_b], axis=1)                    # (B, 2C)
    bro = jnp.dot(sel_ref[...], sb, preferred_element_type=jnp.float32)  # (HW*B, 2C)

    o_ref[...] = (y * bro[:, :c] + bro[:, c:]).astype(o_ref.dtype)


def bottleneck_apply(x_nchw, w, b, gamma, beta, *,
                     compute_dtype=jnp.float32, out_dtype=jnp.float32):
    """Conv2d(Cin, Cout, 1) + GroupNorm(32, Cout); returns feat_vec (HW, B, Cout)."""
    B, Cin, H, W = x_nchw.shape
    Cout = w.shape[0]
    HW = H * W
    assert Cout % GN_GROUPS == 0, "GroupNorm(32, hidden) requires hidden % 32 == 0"

    # Rows ordered (hw, b): the kernel output is then already in the
    # flatten(2).permute(2,0,1) layout -> no output-side HBM transpose.
    # (In the full model this single input materialization happens once/level.)
    xr = jnp.transpose(x_nchw, (2, 3, 0, 1)).reshape(HW * B, Cin).astype(compute_dtype)
    w_t = jnp.transpose(w, (1, 0)).astype(compute_dtype)                # (Cin, Cout)
    b2 = b.reshape(1, Cout).astype(jnp.float32)
    g2 = gamma.reshape(1, Cout).astype(jnp.float32)
    be2 = beta.reshape(1, Cout).astype(jnp.float32)

    # One-hot selector matrices precomputed outside the kernel.
    row = jnp.arange(HW * B, dtype=jnp.int32)
    sel = (row[:, None] % B == jnp.arange(B, dtype=jnp.int32)[None, :]).astype(jnp.float32)
    sel_t = jnp.transpose(sel, (1, 0))
    ch = jnp.arange(Cout, dtype=jnp.int32)
    agg = (ch[:, None] // (Cout // GN_GROUPS)
           == jnp.arange(GN_GROUPS, dtype=jnp.int32)[None, :]).astype(jnp.float32)
    agg_t = jnp.transpose(agg, (1, 0))

    out = pl.pallas_call(
        _bottleneck_kernel,
        out_shape=jax.ShapeDtypeStruct((HW * B, Cout), out_dtype),
    )(xr, w_t, b2, g2, be2, sel, sel_t, agg, agg_t)

    # Free reshape (split of the leading dim): (HW*B, C) -> (HW, B, C).
    return out.reshape(HW, B, Cout)


# ----------------------------------------------------------------------------
# Kernel 2: bbox_embed MLP (3 layers) + inverse_sigmoid(reference) add, B folded
# ----------------------------------------------------------------------------
def _bbox_head_kernel(x_ref, ref_ref, w1_ref, b1_ref, w2_ref, b2_ref,
                      w3_ref, b3_ref, o_ref):
    # x_ref:   (B*Nq, C), ref_ref: (B*Nq, 2), o_ref: (B*Nq, 8)
    x = x_ref[...].astype(jnp.float32)
    h = jnp.dot(x, w1_ref[...], preferred_element_type=jnp.float32) + b1_ref[...]
    h = jnp.maximum(h, 0.0)
    h = jnp.dot(h, w2_ref[...], preferred_element_type=jnp.float32) + b2_ref[...]
    h = jnp.maximum(h, 0.0)
    tmp = jnp.dot(h, w3_ref[...], preferred_element_type=jnp.float32) + b3_ref[...]  # (B*Nq, 8)

    # inverse_sigmoid(reference), reference last dim == 2 in this model.
    r = jnp.clip(ref_ref[...].astype(jnp.float32), 0.0, 1.0)
    r_inv = jnp.log(jnp.maximum(r, INV_SIG_EPS) / jnp.maximum(1.0 - r, INV_SIG_EPS))

    # tmp[..., :4] += ref[..., 0:1] ; tmp[..., 4:8] += ref[..., 1:2]
    col = jax.lax.broadcasted_iota(jnp.int32, tmp.shape, 1)
    add = jnp.where(col < 4, r_inv[:, 0:1], r_inv[:, 1:2])
    o_ref[...] = (tmp + add).astype(o_ref.dtype)


def bbox_head_apply(output_embed, inter_references, params):
    """bbox_embed MLP + reference add (head_type='MLP' forward_transformer tail)."""
    B, Nq, C = output_embed.shape
    assert inter_references.shape[-1] == 2
    x2 = output_embed.reshape(B * Nq, C)
    r2 = inter_references.reshape(B * Nq, 2)

    out = pl.pallas_call(
        _bbox_head_kernel,
        out_shape=jax.ShapeDtypeStruct((B * Nq, 8), jnp.float32),
    )(x2, r2,
      params["w1"], params["b1"], params["w2"], params["b2"],
      params["w3"], params["b3"])
    # TODO(synk): self.box_head (external module) consumes this output; not
    #             part of `match`'s own parameters.
    return out.reshape(B, Nq, 8)


# ----------------------------------------------------------------------------
# Pure-JAX references (for correctness check)
# ----------------------------------------------------------------------------
def _bottleneck_ref(x_nchw, w, b, gamma, beta):
    y = jnp.einsum("bchw,oc->bohw", x_nchw, w) + b[None, :, None, None]
    B, C, H, W = y.shape
    yg = y.reshape(B, GN_GROUPS, C // GN_GROUPS, H, W)
    mean = yg.mean(axis=(2, 3, 4), keepdims=True)
    var = yg.var(axis=(2, 3, 4), keepdims=True)
    yn = ((yg - mean) / jnp.sqrt(var + GN_EPS)).reshape(B, C, H, W)
    yn = yn * gamma[None, :, None, None] + beta[None, :, None, None]
    return jnp.transpose(yn.reshape(B, C, H * W), (2, 0, 1))   # (HW, B, C)


def _bbox_head_ref(x, ref, p):
    h = jax.nn.relu(x @ p["w1"] + p["b1"][0])
    h = jax.nn.relu(h @ p["w2"] + p["b2"][0])
    tmp = h @ p["w3"] + p["b3"][0]
    r = jnp.clip(ref, 0.0, 1.0)
    r_inv = jnp.log(jnp.maximum(r, INV_SIG_EPS) / jnp.maximum(1.0 - r, INV_SIG_EPS))
    tmp = tmp.at[..., :4].add(r_inv[..., 0:1])
    tmp = tmp.at[..., 4:8].add(r_inv[..., 1:2])
    return tmp


# ----------------------------------------------------------------------------
if __name__ == "__main__":
    key = jax.random.PRNGKey(0)
    ks = jax.random.split(key, 16)

    # Small shapes consistent with the module
    B, Cin, Hsp, Wsp = 2, 8, 8, 8          # backbone feature map (NCHW)
    hidden = 64                             # transformer.d_model (div. by 32 for GroupNorm)
    Nq = 8                                  # num_queries

    # --- bottleneck (Conv2d 1x1 + GroupNorm(32, hidden)) params
    conv_w = jax.random.normal(ks[0], (hidden, Cin), jnp.float32) * 0.1
    conv_b = jax.random.normal(ks[1], (hidden,), jnp.float32) * 0.1
    gn_gamma = 1.0 + 0.05 * jax.random.normal(ks[2], (hidden,), jnp.float32)
    gn_beta = 0.05 * jax.random.normal(ks[3], (hidden,), jnp.float32)

    # --- bbox_embed MLP(hidden, hidden, 8, 3) params
    mlp = {
        "w1": jax.random.normal(ks[4], (hidden, hidden), jnp.float32) * 0.1,
        "b1": jax.random.normal(ks[5], (1, hidden), jnp.float32) * 0.1,
        "w2": jax.random.normal(ks[6], (hidden, hidden), jnp.float32) * 0.1,
        "b2": jax.random.normal(ks[7], (1, hidden), jnp.float32) * 0.1,
        "w3": jax.random.normal(ks[8], (hidden, 8), jnp.float32) * 0.1,
        "b3": jax.random.normal(ks[9], (1, 8), jnp.float32) * 0.1,
    }

    # query_embed (nn.Embedding(num_queries, hidden*2)) — parameter only,
    # consumed by the external transformer.
    query_embed = jax.random.normal(ks[10], (Nq, 2 * hidden), jnp.float32) * 0.1

    # --- inputs
    feat_nchw = jax.random.normal(ks[11], (B, Cin, Hsp, Wsp), jnp.float32)       # backbone feature
    mask = jnp.zeros((B, Hsp, Wsp), jnp.bool_)                                   # NestedTensor mask
    output_embed = jax.random.normal(ks[12], (B, Nq, hidden), jnp.float32)       # transformer output
    inter_refs = jax.nn.sigmoid(jax.random.normal(ks[13], (B, Nq, 2), jnp.float32))

    # === mode='backbone_template' / 'backbone_search' adjust path ===
    feat_vec = bottleneck_apply(feat_nchw, conv_w, conv_b, gn_gamma, gn_beta)    # (HW, B, hidden)
    jax.block_until_ready(feat_vec)
    # bf16 matmul-input variant (v6e/v7x lever: half the DMA bytes, 2x MXU rate)
    feat_vec_bf16 = bottleneck_apply(feat_nchw, conv_w, conv_b, gn_gamma, gn_beta,
                                     compute_dtype=jnp.bfloat16)
    jax.block_until_ready(feat_vec_bf16)
    mask_vec = mask.reshape(B, -1)                                               # mask.flatten(1)

    # === mode='transformer' tail (bbox_embed + inverse_sigmoid reference add) ===
    tmp_out = bbox_head_apply(output_embed, inter_refs, mlp)                     # (B, Nq, 8)
    jax.block_until_ready(tmp_out)

    # --- correctness checks vs pure-JAX reference
    ref_feat = _bottleneck_ref(feat_nchw, conv_w, conv_b, gn_gamma, gn_beta)
    ref_tmp = _bbox_head_ref(output_embed, inter_refs, mlp)
    assert feat_vec.shape == (Hsp * Wsp, B, hidden)
    assert mask_vec.shape == (B, Hsp * Wsp)
    assert tmp_out.shape == (B, Nq, 8)
    assert jnp.allclose(feat_vec, ref_feat, atol=1e-4, rtol=1e-4)
    assert jnp.allclose(feat_vec_bf16, ref_feat, atol=5e-2, rtol=5e-2)
    assert jnp.allclose(tmp_out, ref_tmp, atol=1e-4, rtol=1e-4)

    print("KERNEL_OK")
</pallas_src>

<mosaic_0001>
module attributes {stable_mosaic.version = 11 : i64} {
  func.func @_bottleneck_kernel(%arg0: memref<128x8xf32, #tpu.memory_space<vmem>>, %arg1: memref<8x64xf32, #tpu.memory_space<vmem>>, %arg2: memref<1x64xf32, #tpu.memory_space<vmem>>, %arg3: memref<1x64xf32, #tpu.memory_space<vmem>>, %arg4: memref<1x64xf32, #tpu.memory_space<vmem>>, %arg5: memref<128x2xf32, #tpu.memory_space<vmem>>, %arg6: memref<2x128xf32, #tpu.memory_space<vmem>>, %arg7: memref<64x32xf32, #tpu.memory_space<vmem>>, %arg8: memref<32x64xf32, #tpu.memory_space<vmem>>, %arg9: memref<128x64xf32, #tpu.memory_space<vmem>>) attributes {dimension_semantics = [], scalar_prefetch = 0 : i64, scratch_operands = 0 : i64, tpu.core_type = #tpu.core_type<tc>} {
    %c0 = arith.constant 0 : index
    %c0_0 = arith.constant 0 : index
    %0 = vector.load %arg0[%c0, %c0_0] : memref<128x8xf32, #tpu.memory_space<vmem>>, vector<128x8xf32>
    %c0_1 = arith.constant 0 : index
    %c0_2 = arith.constant 0 : index
    %1 = vector.load %arg1[%c0_1, %c0_2] : memref<8x64xf32, #tpu.memory_space<vmem>>, vector<8x64xf32>
    %cst = arith.constant dense<0.000000e+00> : vector<128x64xf32>
    %2 = tpu.matmul %0, %1, %cst {dimension_numbers = #tpu.dot_dimension_numbers<[1], [0], [0], [1], [0, 0, 1, 1], [], []>} : vector<128x8xf32>, vector<8x64xf32>, vector<128x64xf32> -> vector<128x64xf32>
    %c0_3 = arith.constant 0 : index
    %c0_4 = arith.constant 0 : index
    %3 = vector.load %arg2[%c0_3, %c0_4] : memref<1x64xf32, #tpu.memory_space<vmem>>, vector<1x64xf32>
    %4 = vector.broadcast %3 : vector<1x64xf32> to vector<128x64xf32>
    %5 = arith.addf %2, %4 : vector<128x64xf32>
    %6 = arith.mulf %5, %5 : vector<128x64xf32>
    %7 = tpu.concatenate %5, %6 in 1 : vector<128x64xf32>, vector<128x64xf32> -> vector<128x128xf32>
    %c0_5 = arith.constant 0 : index
    %c0_6 = arith.constant 0 : index
    %8 = vector.load %arg6[%c0_5, %c0_6] : memref<2x128xf32, #tpu.memory_space<vmem>>, vector<2x128xf32>
    %cst_7 = arith.constant dense<0.000000e+00> : vector<2x128xf32>
    %9 = tpu.matmul %8, %7, %cst_7 {dimension_numbers = #tpu.dot_dimension_numbers<[1], [0], [0], [1], [0, 0, 1, 1], [], []>} : vector<2x128xf32>, vector<128x128xf32>, vector<2x128xf32> -> vector<2x128xf32>
    %10 = vector.extract_strided_slice %9 {offsets = [0, 0], sizes = [2, 64], strides = [1, 1]} : vector<2x128xf32> to vector<2x64xf32>
    %11 = vector.extract_strided_slice %9 {offsets = [0, 64], sizes = [2, 64], strides = [1, 1]} : vector<2x128xf32> to vector<2x64xf32>
    %12 = tpu.concatenate %10, %11 in 0 : vector<2x64xf32>, vector<2x64xf32> -> vector<4x64xf32>
    %c0_8 = arith.constant 0 : index
    %c0_9 = arith.constant 0 : index
    %13 = vector.load %arg7[%c0_8, %c0_9] : memref<64x32xf32, #tpu.memory_space<vmem>>, vector<64x32xf32>
    %cst_10 = arith.constant dense<0.000000e+00> : vector<4x32xf32>
    %14 = tpu.matmul %12, %13, %cst_10 {dimension_numbers = #tpu.dot_dimension_numbers<[1], [0], [0], [1], [0, 0, 1, 1], [], []>} : vector<4x64xf32>, vector<64x32xf32>, vector<4x32xf32> -> vector<4x32xf32>
    %c0_11 = arith.constant 0 : index
    %c0_12 = arith.constant 0 : index
    %15 = vector.load %arg8[%c0_11, %c0_12] : memref<32x64xf32, #tpu.memory_space<vmem>>, vector<32x64xf32>
    %cst_13 = arith.constant dense<0.000000e+00> : vector<4x64xf32>
    %16 = tpu.matmul %14, %15, %cst_13 {dimension_numbers = #tpu.dot_dimension_numbers<[1], [0], [0], [1], [0, 0, 1, 1], [], []>} : vector<4x32xf32>, vector<32x64xf32>, vector<4x64xf32> -> vector<4x64xf32>
    %17 = vector.extract_strided_slice %16 {offsets = [0, 0], sizes = [2, 64], strides = [1, 1]} : vector<4x64xf32> to vector<2x64xf32>
    %cst_14 = arith.constant 1.280000e+02 : f32
    %18 = vector.broadcast %cst_14 : f32 to vector<2x64xf32>
    %19 = arith.divf %17, %18 : vector<2x64xf32>
    %20 = vector.extract_strided_slice %16 {offsets = [2, 0], sizes = [2, 64], strides = [1, 1]} : vector<4x64xf32> to vector<2x64xf32>
    %cst_15 = arith.constant 1.280000e+02 : f32
    %21 = vector.broadcast %cst_15 : f32 to vector<2x64xf32>
    %22 = arith.divf %20, %21 : vector<2x64xf32>
    %23 = arith.mulf %19, %19 : vector<2x64xf32>
    %24 = arith.subf %22, %23 : vector<2x64xf32>
    %cst_16 = arith.constant 0.000000e+00 : f32
    %25 = vector.broadcast %cst_16 : f32 to vector<2x64xf32>
    %26 = arith.maximumf %24, %25 : vector<2x64xf32>
    %cst_17 = arith.constant 9.99999974E-6 : f32
    %27 = vector.broadcast %cst_17 : f32 to vector<2x64xf32>
    %28 = arith.addf %26, %27 : vector<2x64xf32>
    %29 = math.rsqrt %28 : vector<2x64xf32>
    %c0_18 = arith.constant 0 : index
    %c0_19 = arith.constant 0 : index
    %30 = vector.load %arg3[%c0_18, %c0_19] : memref<1x64xf32, #tpu.memory_space<vmem>>, vector<1x64xf32>
    %31 = vector.broadcast %30 : vector<1x64xf32> to vector<2x64xf32>
    %32 = arith.mulf %29, %31 : vector<2x64xf32>
    %c0_20 = arith.constant 0 : index
    %c0_21 = arith.constant 0 : index
    %33 = vector.load %arg4[%c0_20, %c0_21] : memref<1x64xf32, #tpu.memory_space<vmem>>, vector<1x64xf32>
    %34 = arith.mulf %19, %32 : vector<2x64xf32>
    %35 = vector.broadcast %33 : vector<1x64xf32> to vector<2x64xf32>
    %36 = arith.subf %35, %34 : vector<2x64xf32>
    %37 = tpu.concatenate %32, %36 in 1 : vector<2x64xf32>, vector<2x64xf32> -> vector<2x128xf32>
    %c0_22 = arith.constant 0 : index
    %c0_23 = arith.constant 0 : index
    %38 = vector.load %arg5[%c0_22, %c0_23] : memref<128x2xf32, #tpu.memory_space<vmem>>, vector<128x2xf32>
    %cst_24 = arith.constant dense<0.000000e+00> : vector<128x128xf32>
    %39 = tpu.matmul %38, %37, %cst_24 {dimension_numbers = #tpu.dot_dimension_numbers<[1], [0], [0], [1], [0, 0, 1, 1], [], []>} : vector<128x2xf32>, vector<2x128xf32>, vector<128x128xf32> -> vector<128x128xf32>
    %40 = vector.extract_strided_slice %39 {offsets = [0, 0], sizes = [128, 64], strides = [1, 1]} : vector<128x128xf32> to vector<128x64xf32>
    %41 = arith.mulf %5, %40 : vector<128x64xf32>
    %42 = vector.extract_strided_slice %39 {offsets = [0, 64], sizes = [128, 64], strides = [1, 1]} : vector<128x128xf32> to vector<128x64xf32>
    %43 = arith.addf %41, %42 : vector<128x64xf32>
    %c0_25 = arith.constant 0 : index
    %c0_26 = arith.constant 0 : index
    %44 = vector.load %arg9[%c0_25, %c0_26] : memref<128x64xf32, #tpu.memory_space<vmem>>, vector<128x64xf32>
    tpu.vector_store %arg9[%c0_25, %c0_26], %43 {strides = array<i32>} : memref<128x64xf32, #tpu.memory_space<vmem>>, vector<128x64xf32>,
    return
  }
}

</mosaic_0001>

<bundles_post_ra>
// kernel: tpu_custom_call.1
= control target key start
LH: loop header
LB: loop body
LE: loop exit
PB: predicated region body
PF: predicated region fallthrough
CT: control target
= control target key end

     0   :  { %vm56_vm0 = vcmask 64512   ;;  %v1258_v18 = vmov 0.0|0.0   ;;  %vm1260_vm1 = vmmov 0   ;;  %vm330_vm2 = vcmask 523264   ;;  %s1736_s1 = inlined_call_operand.vmem [shape: f32[8,64], index: 1, kind: input, shape index: {}]   ;;  %s1737_s0 = inlined_call_operand.vmem [shape: f32[128,8], index: 0, kind: input, shape index: {}]   ;;  %s1738_s2 = inlined_call_operand.vmem [shape: f32[1,64], index: 2, kind: input, shape index: {}]   ;;  %s1739_s6 = inlined_call_operand.vmem [shape: f32[2,128], index: 6, kind: input, shape index: {}]   ;;  %s1740_s7 = inlined_call_operand.vmem [shape: f32[64,32], index: 7, kind: input, shape index: {}]   ;;  %s1741_s8 = inlined_call_operand.vmem [shape: f32[32,64], index: 8, kind: input, shape index: {}]   ;;  %s1742_s3 = inlined_call_operand.vmem [shape: f32[1,64], index: 3, kind: input, shape index: {}]   ;;  %s1743_s5 = inlined_call_operand.vmem [shape: f32[128,2], index: 5, kind: input, shape index: {}]   ;;  %s1744_s4 = inlined_call_operand.vmem [shape: f32[1,64], index: 4, kind: input, shape index: {}]   ;;  %s1745_s9 = inlined_call_operand.vmem [shape: f32[128,64], index: 9, kind: output, shape index: {}]  }
   0x1   :  { %v48_v0 = vld [vmem:[%s1736_s1] sm:$0xff]  ;;  %v33_v2 = vld [vmem:[%s1737_s0 + $0x8] sm:$0xff]  ;;  %v34_v3 = vld [vmem:[%s1737_s0 + $0x10] sm:$0xff]  ;;  %1194 = vmatprep.subr.bf16.mxu0 %v1258_v18  ;;  %vm423_vm3 = vcmask 1041408   ;;  %vm510_vm4 = vcmask 261120   ;;  %vm638_vm5 = vcmask 15360  }
   0x2   :  { %v32_v1 = vld [vmem:[%s1737_s0] sm:$0xff]  ;;  %1053 = vmatprep.subr.mxu1 %v48_v0  ;;  %v35_v4 = vld [vmem:[%s1737_s0 + $0x18] sm:$0xff]  ;;  %v37_v6 = vld [vmem:[%s1737_s0 + $0x28] sm:$0xff] }
   0x3   :  { %1055 = vmatprep.mubr.msk.f32.mxu1 %vm56_vm0, %v32_v1  ;;  %1054 = vmatpush3.msra.mxu1 %v48_v0  ;;  %v36_v5 = vld [vmem:[%s1737_s0 + $0x20] sm:$0xff]  ;;  %v38_v7 = vld [vmem:[%s1737_s0 + $0x30] sm:$0xff]  ;;  %v39_v8 = vld [vmem:[%s1737_s0 + $0x38] sm:$0xff] }
   0x4   :  { %1056 = vmatmul.mubr.msk.f32.vlgmr.msra.gmra.mrb[0].mxu1 %vm56_vm0, %v33_v2  ;;  %v40_v9 = vld [vmem:[%s1737_s0 + $0x40] sm:$0xff]  ;;  %v41_v10 = vld [vmem:[%s1737_s0 + $0x48] sm:$0xff]  ;;  %v42_v11 = vld [vmem:[%s1737_s0 + $0x50] sm:$0xff]  ;;  %1170 = vmatprep.subr.bf16.mxu1 %v1258_v18 }
   0x5   :  { %1058 = vmatprep.mubr.msk.f32.mxu1 %vm56_vm0, %v34_v3  ;;  %v43_v12 = vld [vmem:[%s1737_s0 + $0x58] sm:$0xff]  ;;  %v44_v13 = vld [vmem:[%s1737_s0 + $0x60] sm:$0xff]  ;;  %v45_v14 = vld [vmem:[%s1737_s0 + $0x68] sm:$0xff] }
   0x6   :  { %v46_v15 = vld [vmem:[%s1737_s0 + $0x70] sm:$0xff]  ;;  %v47_v16 = vld [vmem:[%s1737_s0 + $0x78] sm:$0xff]  ;;  %v1382_v17 = vld [vmem:[%s1738_s2] ss:$0 sm:$0xff]  ;;  %s1259_s0 = smov 64  }
   0x8   :  { %1059 = vmatmul.mubr.msk.f32.gmra.mrb[2].mxu1 %vm56_vm0, %v35_v4 }
   0x9   :  { %1061 = vmatprep.mubr.msk.f32.mxu1 %vm56_vm0, %v36_v5 }
   0xc   :  { %1062 = vmatmul.mubr.msk.f32.gmra.mrb[4].mxu1 %vm56_vm0, %v37_v6  ;;  %v1261_v6 = vmov 0.0  }
   0xd   :  { %1064 = vmatprep.mubr.msk.f32.mxu1 %vm56_vm0, %v38_v7  ;;  %1130 = vmatprep.mubr.msk.f32.mxu0 %vm1260_vm1, %v1261_v6 }
  0x10   :  { %1065 = vmatmul.mubr.msk.f32.gmra.mrb[6].mxu1 %vm56_vm0, %v39_v8 }
  0x11   :  { %1067 = vmatprep.mubr.msk.f32.mxu1 %vm56_vm0, %v40_v9 }
  0x14   :  { %1068 = vmatmul.mubr.msk.f32.gmra.mrb[8].mxu1 %vm56_vm0, %v41_v10 }
  0x15   :  { %1070 = vmatprep.mubr.msk.f32.mxu1 %vm56_vm0, %v42_v11 }
  0x18   :  { %1071 = vmatmul.mubr.msk.f32.gmra.mrb[10].mxu1 %vm56_vm0, %v43_v12 }
  0x19   :  { %1073 = vmatprep.mubr.msk.f32.mxu1 %vm56_vm0, %v44_v13 }
  0x1c   :  { %1074 = vmatmul.mubr.msk.f32.gmra.mrb[12].mxu1 %vm56_vm0, %v45_v14 }
  0x1d   :  { %1076 = vmatprep.mubr.msk.f32.mxu1 %vm56_vm0, %v46_v15 }
  0x20   :  { %1077 = vmatmul.mubr.msk.f32.gmra.mrb[14].mxu1 %vm56_vm0, %v47_v16 }
  0x21   :  { %1111 = vmatprep.mubr.msk.f32.mxu1 %vm1260_vm1, %v1261_v6 }
  0xd7   :  { %v1057_v19 = vpop.f32.mrb[0].mxu1 }
  0xd8   :  { %v1387_v20 = vadd.f32 %v1057_v19, %v1382_v17  ;;  %v171_v21 = vpop.f32.mrb[1].mxu1 }
  0xd9   :  { %v1390_v22 = vadd.f32 %v1382_v17, %v171_v21 }
  0xda   :  { %v251_v23 = vmul.f32 %v1387_v20, %v1387_v20 }
  0xdb   :  { %v1060_v24 = vpop.f32.mrb[2].mxu1  ;;  %v250_v25 = vmul.f32 %v1390_v22, %v1390_v22 }
  0xdc   :  { %v1397_v26 = vadd.f32 %v1060_v24, %v1382_v17  ;;  %v181_v27 = vpop.f32.mrb[3].mxu1 }
  0xdd   :  { %v1400_v28 = vadd.f32 %v1382_v17, %v181_v27  ;;  %v1216_v29 = vpack.i.bf16 %v251_v23, %v250_v25 }
  0xde   :  { %v253_v30 = vmul.f32 %v1397_v26, %v1397_v26 }
  0xdf   :  { %v252_v31 = vmul.f32 %v1400_v28, %v1400_v28  ;;  %v1063_v32 = vpop.f32.mrb[4].mxu1  ;;  %1217 = vrot.lane.b32.xlu0 %v1216_v29, %s1259_s0 }
  0xe0   :  { %v1408_v33 = vadd.f32 %v1063_v32, %v1382_v17  ;;  %v191_v34 = vpop.f32.mrb[5].mxu1 }
  0xe1   :  { %v1411_v35 = vadd.f32 %v1382_v17, %v191_v34  ;;  %v1221_v36 = vpack.i.bf16 %v253_v30, %v252_v31 }
  0xe2   :  { %v255_v37 = vmul.f32 %v1408_v33, %v1408_v33 }
  0xe3   :  { %v1066_v38 = vpop.f32.mrb[6].mxu1  ;;  %1222 = vrot.lane.b32.xlu0 %v1221_v36, %s1259_s0  ;;  %v254_v39 = vmul.f32 %v1411_v35, %v1411_v35 }
  0xe4   :  { %v1419_v40 = vadd.f32 %v1066_v38, %v1382_v17  ;;  %v201_v41 = vpop.f32.mrb[7].mxu1 }
  0xe5   :  { %v1422_v42 = vadd.f32 %v1382_v17, %v201_v41  ;;  %v1226_v43 = vpack.i.bf16 %v255_v37, %v254_v39 }
  0xe6   :  { %v257_v44 = vmul.f32 %v1419_v40, %v1419_v40 }
  0xe7   :  { %v256_v45 = vmul.f32 %v1422_v42, %v1422_v42  ;;  %v1069_v46 = vpop.f32.mrb[8].mxu1  ;;  %1227 = vrot.lane.b32.xlu1 %v1226_v43, %s1259_s0 }
  0xe8   :  { %v1430_v47 = vadd.f32 %v1069_v46, %v1382_v17  ;;  %v211_v48 = vpop.f32.mrb[9].mxu1 }
  0xe9   :  { %v1433_v49 = vadd.f32 %v1382_v17, %v211_v48  ;;  %v1231_v50 = vpack.i.bf16 %v257_v44, %v256_v45 }
  0xea   :  { %v259_v51 = vmul.f32 %v1430_v47, %v1430_v47 }
  0xeb   :  { %v258_v52 = vmul.f32 %v1433_v49, %v1433_v49  ;;  %v1072_v53 = vpop.f32.mrb[10].mxu1  ;;  %1232 = vrot.lane.b32.xlu1 %v1231_v50, %s1259_s0 }
  0xec   :  { %v1441_v54 = vadd.f32 %v1072_v53, %v1382_v17  ;;  %v221_v55 = vpop.f32.mrb[11].mxu1 }
  0xed   :  { %v1444_v56 = vadd.f32 %v1382_v17, %v221_v55  ;;  %v1236_v57 = vpack.i.bf16 %v259_v51, %v258_v52 }
  0xee   :  { %v261_v58 = vmul.f32 %v1441_v54, %v1441_v54 }
  0xef   :  { %v260_v59 = vmul.f32 %v1444_v56, %v1444_v56  ;;  %v1075_v60 = vpop.f32.mrb[12].mxu1  ;;  %1237 = vrot.lane.b32.xlu0 %v1236_v57, %s1259_s0 }
  0xf0   :  { %v1452_v61 = vadd.f32 %v1075_v60, %v1382_v17  ;;  %v231_v62 = vpop.f32.mrb[13].mxu1 }
  0xf1   :  { %v1455_v63 = vadd.f32 %v1382_v17, %v231_v62  ;;  %v1241_v0 = vpack.i.bf16 %v261_v58, %v260_v59 }
  0xf2   :  { %v263_v1 = vmul.f32 %v1452_v61, %v1452_v61 }
  0xf3   :  { %v262_v2 = vmul.f32 %v1455_v63, %v1455_v63  ;;  %v1078_v3 = vpop.f32.mrb[14].mxu1  ;;  %1242 = vrot.lane.b32.xlu1 %v1241_v0, %s1259_s0 }
  0xf4   :  { %v1463_v4 = vadd.f32 %v1078_v3, %v1382_v17  ;;  %v241_v5 = vpop.f32.mrb[15].mxu1 }
  0xf5   :  { %v1470_v7 = vadd.f32 %v1382_v17, %v241_v5  ;;  %v1246_v8 = vpack.i.bf16 %v263_v1, %v262_v2 }
  0xf6   :  { %v265_v9 = vmul.f32 %v1463_v4, %v1463_v4 }
  0xf7   :  { %v264_v10 = vmul.f32 %v1470_v7, %v1470_v7  ;;  %1247 = vrot.lane.b32.xlu0 %v1246_v8, %s1259_s0 }
  0xf9   :  { %v1251_v11 = vpack.i.bf16 %v265_v9, %v264_v10 }
  0xfb   :  { %1252 = vrot.lane.b32.xlu1 %v1251_v11, %s1259_s0 }
 0x151   :  { %v1218_v12 = vpop.permute.xlu0 %1217 }
 0x152   :  { %v1220_v13 = vunpack.i.h.bf16 %v1218_v12  ;;  %v1219_v14 = vunpack.i.l.bf16 %v1218_v12 }
 0x154   :  { %v332_v15 = vsel %vm330_vm2, %v1387_v20, %v1220_v13  ;;  %v331_v16 = vsel %vm330_vm2, %v1390_v22, %v1219_v14  ;;  %v347_v14 = vld [vmem:[%s1739_s6] sm:$0x3] }
 0x155   :  { %v1171_v17 = vpack.c.bf16 %v332_v15, %v331_v16  ;;  %v1223_v19 = vpop.permute.xlu0 %1222  ;;  %v425_v15 = vld [vmem:[%s1740_s7] sm:$0xff]  ;;  %v426_v16 = vld [vmem:[%s1740_s7 + $0x8] sm:$0xff] }
 0x156   :  { %v1225_v21 = vunpack.i.h.bf16 %v1223_v19  ;;  %v1224_v23 = vunpack.i.l.bf16 %v1223_v19  ;;  %v1195_v19 = vpack.c.bf16 %v426_v16, %v425_v15  ;;  %v624_v15 = vld [vmem:[%s1743_s5 + $0x20] sm:$0xff]  ;;  %v625_v16 = vld [vmem:[%s1743_s5 + $0x28] sm:$0xff] }
 0x157   :  { %1172 = vmatpush3.bf16.msra.mxu1 %v1171_v17  ;;  %v427_v17 = vld [vmem:[%s1740_s7 + $0x10] sm:$0xff] }
 0x158   :  { %v334_v24 = vsel %vm330_vm2, %v1397_v26, %v1225_v21  ;;  %v333_v25 = vsel %vm330_vm2, %v1400_v28, %v1224_v23  ;;  %1173 = vmatprep.subr.bf16.mxu1 %v1258_v18  ;;  %v428_v21 = vld [vmem:[%s1740_s7 + $0x18] sm:$0xff]  ;;  %1196 = vmatpush3.bf16.msra.mxu0 %v1195_v19 }
 0x159   :  { %v1174_v27 = vpack.c.bf16 %v334_v24, %v333_v25  ;;  %v1228_v29 = vpop.permute.xlu1 %1227  ;;  %v1198_v23 = vpack.c.bf16 %v428_v21, %v427_v17  ;;  %1197 = vmatprep.subr.bf16.mxu0 %v1258_v18  ;;  %v430_v24 = vld [vmem:[%s1740_s7 + $0x28] sm:$0xff]  ;;  %v626_v17 = vld [vmem:[%s1743_s5 + $0x30] sm:$0xff]  ;;  %v627_v19 = vld [vmem:[%s1743_s5 + $0x38] sm:$0xff] }
 0x15a   :  { %v1230_v30 = vunpack.i.h.bf16 %v1228_v29  ;;  %v1229_v31 = vunpack.i.l.bf16 %v1228_v29  ;;  %v432_v29 = vld [vmem:[%s1740_s7 + $0x38] sm:$0xff]  ;;  %v628_v21 = vld [vmem:[%s1743_s5 + $0x40] sm:$0xff] }
 0x15b   :  { %1175 = vmatpush3.bf16.msra.mxu1 %v1174_v27  ;;  %v431_v27 = vld [vmem:[%s1740_s7 + $0x30] sm:$0xff] }
 0x15c   :  { %v336_v32 = vsel %vm330_vm2, %v1408_v33, %v1230_v30  ;;  %v335_v34 = vsel %vm330_vm2, %v1411_v35, %v1229_v31  ;;  %1176 = vmatprep.subr.bf16.mxu1 %v1258_v18  ;;  %1199 = vmatpush3.bf16.msra.mxu0 %v1198_v23  ;;  %v1204_v30 = vpack.c.bf16 %v432_v29, %v431_v27  ;;  %v506_v31 = vld [vmem:[%s1741_s8] sm:$0xff]  ;;  %v629_v23 = vld [vmem:[%s1743_s5 + $0x48] sm:$0xff]  ;;  %v634_v29 = vld [vmem:[%s1743_s5 + $0x70] sm:$0xff] }
 0x15d   :  { %v1177_v36 = vpack.c.bf16 %v336_v32, %v335_v34  ;;  %v1233_v37 = vpop.permute.xlu1 %1232  ;;  %1200 = vmatprep.subr.bf16.mxu0 %v1258_v18  ;;  %v507_v32 = vld [vmem:[%s1741_s8 + $0x8] sm:$0xff]  ;;  %v508_v34 = vld [vmem:[%s1741_s8 + $0x10] sm:$0xff] }
 0x15e   :  { %v1235_v38 = vunpack.i.h.bf16 %v1233_v37  ;;  %v1234_v39 = vunpack.i.l.bf16 %v1233_v37  ;;  %v509_v37 = vld [vmem:[%s1741_s8 + $0x18] sm:$0xff]  ;;  %v633_v27 = vld [vmem:[%s1743_s5 + $0x68] sm:$0xff] }
 0x15f   :  { %1178 = vmatpush3.bf16.msra.mxu1 %v1177_v36  ;;  %v1207_v36 = vpack.c.bf16 %v507_v32, %v506_v31 }
 0x160   :  { %v338_v41 = vsel %vm330_vm2, %v1419_v40, %v1235_v38  ;;  %v337_v43 = vsel %vm330_vm2, %v1422_v42, %v1234_v39  ;;  %1179 = vmatprep.subr.bf16.mxu1 %v1258_v18  ;;  %v1210_v38 = vpack.c.bf16 %v509_v37, %v508_v34 }
 0x161   :  { %v1180_v44 = vpack.c.bf16 %v338_v41, %v337_v43  ;;  %v1238_v45 = vpop.permute.xlu0 %1237 }
 0x162   :  { %v1240_v46 = vunpack.i.h.bf16 %v1238_v45  ;;  %v1239_v48 = vunpack.i.l.bf16 %v1238_v45 }
 0x163   :  { %1181 = vmatpush3.bf16.msra.mxu1 %v1180_v44 }
 0x164   :  { %v340_v50 = vsel %vm330_vm2, %v1430_v47, %v1240_v46  ;;  %v339_v51 = vsel %vm330_vm2, %v1433_v49, %v1239_v48  ;;  %1182 = vmatprep.subr.bf16.mxu1 %v1258_v18 }
 0x165   :  { %v1183_v52 = vpack.c.bf16 %v340_v50, %v339_v51  ;;  %v1243_v53 = vpop.permute.xlu1 %1242 }
 0x166   :  { %v1245_v55 = vunpack.i.h.bf16 %v1243_v53  ;;  %v1244_v57 = vunpack.i.l.bf16 %v1243_v53 }
 0x167   :  { %1184 = vmatpush3.bf16.msra.mxu1 %v1183_v52 }
 0x168   :  { %v342_v58 = vsel %vm330_vm2, %v1441_v54, %v1245_v55  ;;  %v341_v59 = vsel %vm330_vm2, %v1444_v56, %v1244_v57  ;;  %1185 = vmatprep.subr.bf16.mxu1 %v1258_v18 }
 0x169   :  { %v1186_v60 = vpack.c.bf16 %v342_v58, %v341_v59  ;;  %v1248_v62 = vpop.permute.xlu0 %1247  ;;  %v969_v59 = vld [vmem:[%s1742_s3] ss:$0 sm:$0xff] }
 0x16a   :  { %v1250_v0 = vunpack.i.h.bf16 %v1248_v62  ;;  %v1249_v1 = vunpack.i.l.bf16 %v1248_v62 }
 0x16b   :  { %1187 = vmatpush3.bf16.msra.mxu1 %v1186_v60 }
 0x16c   :  { %v344_v2 = vsel %vm330_vm2, %v1452_v61, %v1250_v0  ;;  %v343_v3 = vsel %vm330_vm2, %v1455_v63, %v1249_v1  ;;  %1188 = vmatprep.subr.bf16.mxu1 %v1258_v18  ;;  %v620_v0 = vld [vmem:[%s1743_s5] sm:$0xff] }
 0x16d   :  { %v1189_v5 = vpack.c.bf16 %v344_v2, %v343_v3  ;;  %v1253_v8 = vpop.permute.xlu1 %1252  ;;  %v970_v2 = vld [vmem:[%s1744_s4] ss:$0 sm:$0xff] }
 0x16e   :  { %v1255_v9 = vunpack.i.h.bf16 %v1253_v8  ;;  %v1254_v10 = vunpack.i.l.bf16 %v1253_v8 }
 0x16f   :  { %1190 = vmatpush3.bf16.msra.mxu1 %v1189_v5 }
 0x170   :  { %v346_v11 = vsel %vm330_vm2, %v1463_v4, %v1255_v9  ;;  %v345_v12 = vsel %vm330_vm2, %v1470_v7, %v1254_v10  ;;  %1191 = vmatprep.subr.bf16.mxu1 %v1258_v18 }
 0x171   :  { %v1192_v13 = vpack.c.bf16 %v346_v11, %v345_v12  ;;  %v621_v12 = vld [vmem:[%s1743_s5 + $0x8] sm:$0xff] }
 0x173   :  { %1193 = vmatpush3.bf16.msra.mxu1 %v1192_v13  ;;  %v622_v13 = vld [vmem:[%s1743_s5 + $0x10] sm:$0xff] }
 0x174   :  { %1206 = vmatprep.subr.bf16.mxu1 %v1258_v18 }
 0x176   :  { %1112 = vmatmul.mubr.f32.vlgmr.msra.gmra.mrb[16].mxu1 %v347_v14  ;;  %v623_v14 = vld [vmem:[%s1743_s5 + $0x18] sm:$0xff] }
 0x177   :  { %1141 = vmatprep.mubr.msk.f32.mxu1 %vm1260_vm1, %v1261_v6  ;;  %v429_v6 = vld [vmem:[%s1740_s7 + $0x20] sm:$0xff]  ;;  %1208 = vmatpush3.bf16.msra.mxu1 %v1207_v36 }
 0x178   :  { %v1201_v25 = vpack.c.bf16 %v430_v24, %v429_v6  ;;  %1209 = vmatprep.subr.bf16.mxu1 %v1258_v18  ;;  %v630_v6 = vld [vmem:[%s1743_s5 + $0x50] sm:$0xff]  ;;  %v631_v24 = vld [vmem:[%s1743_s5 + $0x58] sm:$0xff] }
 0x17a   :  { %1202 = vmatpush3.bf16.msra.mxu0 %v1201_v25  ;;  %v632_v25 = vld [vmem:[%s1743_s5 + $0x60] sm:$0xff] }
 0x17b   :  { %1203 = vmatprep.subr.bf16.mxu0 %v1258_v18  ;;  %1211 = vmatpush3.bf16.msra.mxu1 %v1210_v38 }
 0x17e   :  { %1205 = vmatpush3.bf16.msra.mxu0 %v1204_v30  ;;  %v635_v30 = vld [vmem:[%s1743_s5 + $0x78] sm:$0xff] }
 0x249   :  { %v414_v39 = vpop.f32.mrb[16].mxu1 }
 0x24a   :  { %v419_v41 = vrot.slane %v414_v39, 6  ;;  %v1113_v43 = vpop.f32.mrb[17].mxu1 }
 0x24c   :  { %420 = vrot.lane.b32.xlu0 %v419_v41, %s1259_s0 }
 0x2be   :  { %v421_v44 = vpop.permute.xlu0 %420 }
 0x2bf   :  { %v424_v45 = vsel %vm423_vm3, %v414_v39, %v421_v44 }
 0x2c0   :  { %1131 = vmatmul.mubr.msk.f32.vlgmr.msra.gmra.mrb[0].mxu0 %vm330_vm2, %v424_v45 }
 0x2c1   :  { %1146 = vmatprep.mubr.msk.f32.mxu0 %vm638_vm5, %v620_v0 }
 0x393   :  { %v502_v46 = vpop.f32.mrb[0].mxu0 }
 0x394   :  { %v1132_v48 = vpop.f32.mrb[1].mxu0  ;;  %1142 = vmatmul.mubr.msk.f32.vlgmr.msra.gmra.mrb[18].mxu1 %vm510_vm4, %v502_v46 }
 0x467   :  { %v580_v50 = vpop.f32.mrb[18].mxu1 }
 0x468   :  { %v585_v51 = vmul.f32 0.0078125, %v580_v50  ;;  %v1143_v52 = vpop.f32.mrb[19].mxu1 }
 0x46a   :  { %v586_v18 = vmul.f32 %v585_v51, %v585_v51 }
 0x46c   :  { %v588_v53 = vrot.slane %v586_v18, 6 }
 0x46e   :  { %v590_v55 = vsub.f32 %v585_v51, %v588_v53 }
 0x470   :  { %v591_v57 = vmax.f32 %v590_v55, 0.0 }
 0x472   :  { %v592_v58 = vadd.f32 1e-05, %v591_v57 }
 0x474   :  { %1256 = vrsqrt.f32 %v592_v58 }
 0x47e   :  { %v1257_v60 = vpop.eup %1256 }
 0x47f   :  { %v601_v62 = vmul.f32 %v1257_v60, %v969_v59 }
 0x481   :  { %v604_v1 = vrot.slane %v601_v62, 2 }
 0x483   :  { %v606_v3 = vmul.f32 %v604_v1, %v585_v51 }
 0x485   :  { %v613_v5 = vsub.f32 %v970_v2, %v606_v3 }
 0x487   :  { %v615_v8 = vrot.slane %v613_v5, 6 }
 0x489   :  { %616 = vrot.lane.b32.xlu1 %v615_v8, %s1259_s0 }
 0x4fb   :  { %v617_v9 = vpop.permute.xlu1 %616 }
 0x4fc   :  { %v619_v10 = vsel %vm330_vm2, %v601_v62, %v617_v9 }
 0x4fd   :  { %v637_v11 = vrot.slane %v619_v10, 2 }
 0x4ff   :  { %1144 = vmatprep.subr.msk.mxu0 %vm423_vm3, %v637_v11 }
 0x500   :  { %1145 = vmatpush3.msk.msra.mxu0 %vm423_vm3, %v637_v11 }
 0x501   :  { %1147 = vmatmul.mubr.msk.f32.vlgmr.msra.gmra.mrb[2].mxu0 %vm638_vm5, %v621_v12 }
 0x502   :  { %1149 = vmatprep.mubr.msk.f32.mxu0 %vm638_vm5, %v622_v13 }
 0x505   :  { %1150 = vmatmul.mubr.msk.f32.gmra.mrb[4].mxu0 %vm638_vm5, %v623_v14 }
 0x506   :  { %1152 = vmatprep.mubr.msk.f32.mxu0 %vm638_vm5, %v624_v15 }
 0x509   :  { %1153 = vmatmul.mubr.msk.f32.gmra.mrb[6].mxu0 %vm638_vm5, %v625_v16 }
 0x50a   :  { %1155 = vmatprep.mubr.msk.f32.mxu0 %vm638_vm5, %v626_v17 }
 0x50d   :  { %1156 = vmatmul.mubr.msk.f32.gmra.mrb[8].mxu0 %vm638_vm5, %v627_v19 }
 0x50e   :  { %1158 = vmatprep.mubr.msk.f32.mxu0 %vm638_vm5, %v628_v21 }
 0x511   :  { %1159 = vmatmul.mubr.msk.f32.gmra.mrb[10].mxu0 %vm638_vm5, %v629_v23 }
 0x512   :  { %1161 = vmatprep.mubr.msk.f32.mxu0 %vm638_vm5, %v630_v6 }
 0x515   :  { %1162 = vmatmul.mubr.msk.f32.gmra.mrb[12].mxu0 %vm638_vm5, %v631_v24 }
 0x516   :  { %1164 = vmatprep.mubr.msk.f32.mxu0 %vm638_vm5, %v632_v25 }
 0x519   :  { %1165 = vmatmul.mubr.msk.f32.gmra.mrb[14].mxu0 %vm638_vm5, %v633_v27 }
 0x51a   :  { %1167 = vmatprep.mubr.msk.f32.mxu0 %vm638_vm5, %v634_v29 }
 0x51d   :  { %1168 = vmatmul.mubr.msk.f32.gmra.mrb[16].mxu0 %vm638_vm5, %v635_v30 }
 0x5d4   :  { %v1148_v31 = vpop.f32.mrb[2].mxu0 }
 0x5d5   :  { %868 = vrot.lane.b32.xlu1 %v1148_v31, %s1259_s0  ;;  %v755_v32 = vpop.f32.mrb[3].mxu0  ;;  %v835_v18 = vmul.f32 %v1148_v31, %v1387_v20 }
 0x5d6   :  { %866 = vrot.lane.b32.xlu0 %v755_v32, %s1259_s0  ;;  %v834_v53 = vmul.f32 %v755_v32, %v1390_v22 }
 0x5d8   :  { %v1151_v34 = vpop.f32.mrb[4].mxu0 }
 0x5d9   :  { %872 = vrot.lane.b32.xlu1 %v1151_v34, %s1259_s0  ;;  %v765_v36 = vpop.f32.mrb[5].mxu0  ;;  %v837_v60 = vmul.f32 %v1151_v34, %v1397_v26 }
 0x5da   :  { %870 = vrot.lane.b32.xlu0 %v765_v36, %s1259_s0  ;;  %v836_v62 = vmul.f32 %v765_v36, %v1400_v28 }
 0x5dc   :  { %v1154_v37 = vpop.f32.mrb[6].mxu0 }
 0x5dd   :  { %876 = vrot.lane.b32.xlu1 %v1154_v37, %s1259_s0  ;;  %v775_v38 = vpop.f32.mrb[7].mxu0  ;;  %v839_v2 = vmul.f32 %v1154_v37, %v1408_v33 }
 0x5de   :  { %874 = vrot.lane.b32.xlu0 %v775_v38, %s1259_s0  ;;  %v838_v26 = vmul.f32 %v775_v38, %v1411_v35 }
 0x5e0   :  { %v1157_v39 = vpop.f32.mrb[8].mxu0 }
 0x5e1   :  { %880 = vrot.lane.b32.xlu1 %v1157_v39, %s1259_s0  ;;  %v785_v41 = vpop.f32.mrb[9].mxu0  ;;  %v841_v9 = vmul.f32 %v1157_v39, %v1419_v40 }
 0x5e2   :  { %878 = vrot.lane.b32.xlu0 %v785_v41, %s1259_s0  ;;  %v840_v33 = vmul.f32 %v785_v41, %v1422_v42 }
 0x5e4   :  { %v1160_v43 = vpop.f32.mrb[10].mxu0 }
 0x5e5   :  { %884 = vrot.lane.b32.xlu1 %v1160_v43, %s1259_s0  ;;  %v795_v44 = vpop.f32.mrb[11].mxu0  ;;  %v843_v13 = vmul.f32 %v1160_v43, %v1430_v47 }
 0x5e6   :  { %882 = vrot.lane.b32.xlu0 %v795_v44, %s1259_s0  ;;  %v842_v40 = vmul.f32 %v795_v44, %v1433_v49 }
 0x5e8   :  { %v1163_v45 = vpop.f32.mrb[12].mxu0 }
 0x5e9   :  { %888 = vrot.lane.b32.xlu1 %v1163_v45, %s1259_s0  ;;  %v805_v46 = vpop.f32.mrb[13].mxu0  ;;  %v845_v17 = vmul.f32 %v1163_v45, %v1441_v54 }
 0x5ea   :  { %886 = vrot.lane.b32.xlu0 %v805_v46, %s1259_s0  ;;  %v844_v47 = vmul.f32 %v805_v46, %v1444_v56 }
 0x5ec   :  { %v1166_v48 = vpop.f32.mrb[14].mxu0 }
 0x5ed   :  { %892 = vrot.lane.b32.xlu1 %v1166_v48, %s1259_s0  ;;  %v815_v50 = vpop.f32.mrb[15].mxu0  ;;  %v847_v6 = vmul.f32 %v1166_v48, %v1452_v61 }
 0x5ee   :  { %890 = vrot.lane.b32.xlu0 %v815_v50, %s1259_s0  ;;  %v846_v54 = vmul.f32 %v815_v50, %v1455_v63 }
 0x5f0   :  { %v1169_v51 = vpop.f32.mrb[16].mxu0 }
 0x5f1   :  { %896 = vrot.lane.b32.xlu1 %v1169_v51, %s1259_s0  ;;  %v825_v52 = vpop.f32.mrb[17].mxu0  ;;  %v849_v29 = vmul.f32 %v1169_v51, %v1463_v4 }
 0x5f2   :  { %894 = vrot.lane.b32.xlu0 %v825_v52, %s1259_s0  ;;  %v848_v61 = vmul.f32 %v825_v52, %v1470_v7 }
 0x647   :  { %v869_v55 = vpop.permute.xlu1 %868 }
 0x648   :  { %v915_v57 = vadd.f32 %v869_v55, %v835_v18  ;;  %v867_v58 = vpop.permute.xlu0 %866 }
 0x649   :  { %v914_v59 = vadd.f32 %v867_v58, %v834_v53 }
 0x64a   :  { %931 = vst.msk [vmem:[%s1745_s9 + $0x8] sm:$0xff] %vm330_vm2, %v915_v57 }
 0x64b   :  { %930 = vst.msk [vmem:[%s1745_s9] sm:$0xff] %vm330_vm2, %v914_v59  ;;  %v873_v20 = vpop.permute.xlu1 %872 }
 0x64c   :  { %v917_v22 = vadd.f32 %v873_v20, %v837_v60  ;;  %v871_v0 = vpop.permute.xlu0 %870 }
 0x64d   :  { %v916_v1 = vadd.f32 %v871_v0, %v836_v62 }
 0x64e   :  { %933 = vst.msk [vmem:[%s1745_s9 + $0x18] sm:$0xff] %vm330_vm2, %v917_v22 }
 0x64f   :  { %932 = vst.msk [vmem:[%s1745_s9 + $0x10] sm:$0xff] %vm330_vm2, %v916_v1  ;;  %v877_v28 = vpop.permute.xlu1 %876 }
 0x650   :  { %v919_v3 = vadd.f32 %v877_v28, %v839_v2  ;;  %v875_v5 = vpop.permute.xlu0 %874 }
 0x651   :  { %v918_v8 = vadd.f32 %v875_v5, %v838_v26 }
 0x652   :  { %935 = vst.msk [vmem:[%s1745_s9 + $0x28] sm:$0xff] %vm330_vm2, %v919_v3 }
 0x653   :  { %934 = vst.msk [vmem:[%s1745_s9 + $0x20] sm:$0xff] %vm330_vm2, %v918_v8  ;;  %v881_v35 = vpop.permute.xlu1 %880 }
 0x654   :  { %v921_v10 = vadd.f32 %v881_v35, %v841_v9  ;;  %v879_v11 = vpop.permute.xlu0 %878 }
 0x655   :  { %v920_v12 = vadd.f32 %v879_v11, %v840_v33 }
 0x656   :  { %937 = vst.msk [vmem:[%s1745_s9 + $0x38] sm:$0xff] %vm330_vm2, %v921_v10 }
 0x657   :  { %936 = vst.msk [vmem:[%s1745_s9 + $0x30] sm:$0xff] %vm330_vm2, %v920_v12  ;;  %v885_v42 = vpop.permute.xlu1 %884 }
 0x658   :  { %v923_v14 = vadd.f32 %v885_v42, %v843_v13  ;;  %v883_v15 = vpop.permute.xlu0 %882 }
 0x659   :  { %v922_v16 = vadd.f32 %v883_v15, %v842_v40 }
 0x65a   :  { %939 = vst.msk [vmem:[%s1745_s9 + $0x48] sm:$0xff] %vm330_vm2, %v923_v14 }
 0x65b   :  { %938 = vst.msk [vmem:[%s1745_s9 + $0x40] sm:$0xff] %vm330_vm2, %v922_v16  ;;  %v889_v49 = vpop.permute.xlu1 %888 }
 0x65c   :  { %v925_v19 = vadd.f32 %v889_v49, %v845_v17  ;;  %v887_v21 = vpop.permute.xlu0 %886 }
 0x65d   :  { %v924_v23 = vadd.f32 %v887_v21, %v844_v47 }
 0x65e   :  { %941 = vst.msk [vmem:[%s1745_s9 + $0x58] sm:$0xff] %vm330_vm2, %v925_v19 }
 0x65f   :  { %940 = vst.msk [vmem:[%s1745_s9 + $0x50] sm:$0xff] %vm330_vm2, %v924_v23  ;;  %v893_v56 = vpop.permute.xlu1 %892 }
 0x660   :  { %v927_v24 = vadd.f32 %v893_v56, %v847_v6  ;;  %v891_v25 = vpop.permute.xlu0 %890 }
 0x661   :  { %v926_v27 = vadd.f32 %v891_v25, %v846_v54 }
 0x662   :  { %943 = vst.msk [vmem:[%s1745_s9 + $0x68] sm:$0xff] %vm330_vm2, %v927_v24 }
 0x663   :  { %942 = vst.msk [vmem:[%s1745_s9 + $0x60] sm:$0xff] %vm330_vm2, %v926_v27  ;;  %v897_v63 = vpop.permute.xlu1 %896 }
 0x664   :  { %v929_v30 = vadd.f32 %v897_v63, %v849_v29  ;;  %v895_v31 = vpop.permute.xlu0 %894 }
 0x665   :  { %v928_v32 = vadd.f32 %v895_v31, %v848_v61 }
 0x666   :  { %945 = vst.msk [vmem:[%s1745_s9 + $0x78] sm:$0xff] %vm330_vm2, %v929_v30 }
 0x667   :  { %944 = vst.msk [vmem:[%s1745_s9 + $0x70] sm:$0xff] %vm330_vm2, %v928_v32 }

</bundles_post_ra>
